<compile_context>
chip_gen: v7x
topology: tpu7x:2x2x1
jax: 0.10.0
libtpu: 0.0.40
codegen_flags: <defaults>
</compile_context>

<pallas_src>
import jax
import jax.numpy as jnp
from jax import lax
from jax.experimental import pallas as pl
from jax.experimental.pallas import tpu as pltpu

_EPS = 1e-12  # F.normalize default eps


def _round_up(x, m):
    return (x + m - 1) // m * m


def _vmem_capacity_bytes():
    try:
        return int(pltpu.get_tpu_info().vmem_capacity_bytes)
    except Exception:
        return 64 * 1024 * 1024  # conservative: v7x per-TensorCore VMEM


# --------------------------------------------------------------------------
# Prologue: row-wise L2 normalization (done once per row).
# --------------------------------------------------------------------------
def _normalize_kernel(z_ref, n_ref):
    z = z_ref[...].astype(jnp.float32)
    sq = jnp.sum(z * z, axis=-1, keepdims=True)
    # max(||z||, eps) == sqrt(max(||z||^2, eps^2)); rsqrt goes to the EUP.
    inv = lax.rsqrt(jnp.maximum(sq, jnp.float32(_EPS * _EPS)))
    n_ref[...] = (z * inv).astype(n_ref.dtype)


def _normalize_rows(z, out_dtype, tile_rows, compiler_params):
    n_rows, d = z.shape
    return pl.pallas_call(
        _normalize_kernel,
        out_shape=jax.ShapeDtypeStruct((n_rows, d), out_dtype),
        grid=(n_rows // tile_rows,),
        in_specs=[pl.BlockSpec((tile_rows, d), lambda i: (i, 0))],
        out_specs=pl.BlockSpec((tile_rows, d), lambda i: (i, 0)),
        compiler_params=compiler_params,
    )(z)


# --------------------------------------------------------------------------
# Shared per-tile computation.
#   sim[i,j]   = n1_i @ n2_j^T
#   sim.T[i,j] = n2_i @ n1_j^T   (second MXU matmul, only for i <= j tiles)
# loss_ref block is (1, 8, tile), revisited across j (accumulator pattern).
# --------------------------------------------------------------------------
def _tile_compute(n1_i, n2_j, n2_i, n1_j, sim_ref, loss_ref):
    dn = (((1,), (1,)), ((), ()))  # contract the feature dim of both operands

    sim = lax.dot_general(n1_i, n2_j, dn, preferred_element_type=jnp.float32)
    sim_ref[...] = sim.astype(sim_ref.dtype)

    i = pl.program_id(0)
    j = pl.program_id(1)

    @pl.when(j == 0)
    def _init():
        loss_ref[...] = jnp.zeros_like(loss_ref)

    # Antisymmetry: tile (i, j) and tile (j, i) of (sim - sim.T) contribute the
    # same squared sum, so only the upper triangle is computed (weight 2 off
    # the diagonal).  Saves the transposed matmul for i > j tiles.
    @pl.when(i <= j)
    def _accum():
        sim_t = lax.dot_general(n2_i, n1_j, dn,
                                preferred_element_type=jnp.float32)
        diff = sim - sim_t
        d2 = diff * diff
        rows, cols = d2.shape
        # VPU-only partial reduction: sum groups of 8 rows (vreg-row adds),
        # keeping a lane-dense (8, tile) accumulator.  No XLU reduce, no SMEM.
        part = jnp.sum(d2.reshape(rows // 8, 8, cols), axis=0)
        w = jnp.where(i == j, jnp.float32(1.0), jnp.float32(2.0))
        loss_ref[...] += w * part[None]


def _make_resident_kernel(tile):
    def kernel(n1_ref, n2_ref, sim_ref, loss_ref):
        ri = pl.multiple_of(pl.program_id(0) * tile, tile)
        rj = pl.multiple_of(pl.program_id(1) * tile, tile)
        n1_i = n1_ref[pl.ds(ri, tile), :]
        n2_i = n2_ref[pl.ds(ri, tile), :]
        n1_j = n1_ref[pl.ds(rj, tile), :]
        n2_j = n2_ref[pl.ds(rj, tile), :]
        _tile_compute(n1_i, n2_j, n2_i, n1_j, sim_ref, loss_ref)
    return kernel


def _streamed_kernel(n1_i_ref, n2_j_ref, n2_i_ref, n1_j_ref, sim_ref, loss_ref):
    _tile_compute(n1_i_ref[...], n2_j_ref[...], n2_i_ref[...], n1_j_ref[...],
                  sim_ref, loss_ref)


# --------------------------------------------------------------------------
# Tile / residency selection
# --------------------------------------------------------------------------
def _choose_tile(n, d, itemsize, usable_vmem, max_tile):
    if n <= 128:
        n_pad = _round_up(max(n, 8), 8)
        return n_pad, n_pad
    for tile in (512, 256, 128):
        if tile > max_tile:
            continue
        n_pad = _round_up(n, tile)
        if tile != 128 and n_pad * 2 > n * 3:   # avoid >50% row padding
            continue
        # Worst-case (streamed) footprint: 4 windows x 2 buffers + outputs.
        streamed = (8 * tile * d * itemsize
                    + 2 * tile * tile * 4
                    + 2 * 8 * tile * 4)
        if streamed + (2 << 20) <= usable_vmem:
            return tile, n_pad
    return 128, _round_up(n, 128)


# --------------------------------------------------------------------------
# Wrapper
# --------------------------------------------------------------------------
def relation_consistency_loss(z1, z2, *, max_tile=512, force_streamed=False):
    """Returns (rc_loss scalar, similarity (N, N)) exactly like the nn.Module."""
    assert max_tile % 128 == 0, "max_tile must be a multiple of 128"
    n, d = z1.shape
    assert z2.shape == (n, d)

    # Keep MXU operands bf16 when inputs are bf16 (f32 norms / f32 accumulate).
    compute_dtype = jnp.bfloat16 if z1.dtype == jnp.bfloat16 else jnp.float32
    itemsize = jnp.dtype(compute_dtype).itemsize

    vmem_cap = _vmem_capacity_bytes()
    usable = int(vmem_cap * 0.75)
    vmem_limit = int(vmem_cap * 0.9)

    tile, n_pad = _choose_tile(n, d, itemsize, usable, max_tile)
    gi = gj = n_pad // tile

    # Residency check (conservative: count 2 pipeline buffers per input block,
    # double-buffered sim tile, loss block, plus slack).
    resident_bytes = 2 * 2 * n_pad * d * itemsize
    tile_out_bytes = 2 * tile * tile * 4 + 2 * 8 * tile * 4
    resident = (not force_streamed) and (
        resident_bytes + tile_out_bytes + (2 << 20) <= usable)

    pad = n_pad - n
    z1p = jnp.pad(z1, ((0, pad), (0, 0))) if pad else z1
    z2p = jnp.pad(z2, ((0, pad), (0, 0))) if pad else z2

    main_cp = pltpu.CompilerParams(
        # Per-i-row loss partials make the i axis race-free -> "parallel"
        # (dual-TC v7x shards rows across cores); j stays "arbitrary" because
        # the loss block is revisited/accumulated across it.
        dimension_semantics=("parallel", "arbitrary"),
        vmem_limit_bytes=vmem_limit,
    )
    norm_cp = pltpu.CompilerParams(
        dimension_semantics=("parallel",),
        vmem_limit_bytes=vmem_limit,
    )

    # Normalize every row exactly once.
    n1 = _normalize_rows(z1p, compute_dtype, tile, norm_cp)
    n2 = _normalize_rows(z2p, compute_dtype, tile, norm_cp)

    sim_out = jax.ShapeDtypeStruct((n_pad, n_pad), jnp.float32)
    loss_out = jax.ShapeDtypeStruct((gi, 8, tile), jnp.float32)
    out_specs = (
        pl.BlockSpec((tile, tile), lambda i, j: (i, j)),
        pl.BlockSpec((1, 8, tile), lambda i, j: (i, 0, 0)),
    )

    if resident:
        cost = pl.CostEstimate(
            flops=3 * n_pad * n_pad * d,
            transcendentals=0,
            bytes_accessed=(2 * n_pad * d * itemsize
                            + n_pad * n_pad * 4
                            + gi * 8 * tile * 4),
        )
        sim_p, loss_parts = pl.pallas_call(
            _make_resident_kernel(tile),
            out_shape=(sim_out, loss_out),
            grid=(gi, gj),
            # Full-dims blocks with constant index_map: n1/n2 are DMA'd into
            # VMEM once and stay resident for the whole grid.
            in_specs=[
                pl.BlockSpec((n_pad, d), lambda i, j: (0, 0)),
                pl.BlockSpec((n_pad, d), lambda i, j: (0, 0)),
            ],
            out_specs=out_specs,
            compiler_params=main_cp,
            cost_estimate=cost,
        )(n1, n2)
    else:
        row_spec_i = pl.BlockSpec((tile, d), lambda i, j: (i, 0))
        row_spec_j = pl.BlockSpec((tile, d), lambda i, j: (j, 0))
        cost = pl.CostEstimate(
            flops=3 * n_pad * n_pad * d,
            transcendentals=0,
            bytes_accessed=(2 * gi * gj * tile * d * itemsize
                            + 2 * n_pad * d * itemsize
                            + n_pad * n_pad * 4
                            + gi * 8 * tile * 4),
        )
        sim_p, loss_parts = pl.pallas_call(
            _streamed_kernel,
            out_shape=(sim_out, loss_out),
            grid=(gi, gj),
            in_specs=[row_spec_i, row_spec_j, row_spec_i, row_spec_j],
            out_specs=out_specs,
            compiler_params=main_cp,
            cost_estimate=cost,
        )(n1, n2, n2, n1)

    # Zero-padded rows contribute exactly 0, so divide by the true N^2.
    rc_loss = jnp.sum(loss_parts) / jnp.float32(n * n)
    sim = sim_p[:n, :n]
    return rc_loss, sim


# --------------------------------------------------------------------------
# Pure-JAX reference
# --------------------------------------------------------------------------
def _reference(z1, z2):
    z1 = z1.astype(jnp.float32)
    z2 = z2.astype(jnp.float32)
    n1 = z1 / jnp.maximum(jnp.linalg.norm(z1, axis=-1, keepdims=True), _EPS)
    n2 = z2 / jnp.maximum(jnp.linalg.norm(z2, axis=-1, keepdims=True), _EPS)
    sim = n1 @ n2.T
    loss = (jnp.mean((sim - sim.T) ** 2) + jnp.mean((sim.T - sim) ** 2)) / 2.0
    return loss, sim


if __name__ == "__main__":
    key = jax.random.PRNGKey(0)
    k1, k2, k3, k4 = jax.random.split(key, 4)

    # Case 1: tiny single-block problem (N=8 embeddings, hidden=32).
    N1, D1 = 8, 32
    a1 = jax.random.normal(k1, (N1, D1), dtype=jnp.float32)
    b1 = jax.random.normal(k2, (N1, D1), dtype=jnp.float32)
    loss1, sim1 = relation_consistency_loss(a1, b1)
    jax.block_until_ready((loss1, sim1))
    ref_l1, ref_s1 = _reference(a1, b1)
    assert sim1.shape == (N1, N1)
    assert jnp.allclose(sim1, ref_s1, atol=1e-5), "similarity mismatch (case 1)"
    assert jnp.allclose(loss1, ref_l1, atol=1e-5), "loss mismatch (case 1)"

    # Case 2: multi-tile (2x2) grid with row padding, VMEM-resident path.
    N2, D2 = 200, 32
    a2 = jax.random.normal(k3, (N2, D2), dtype=jnp.float32)
    b2 = jax.random.normal(k4, (N2, D2), dtype=jnp.float32)
    loss2, sim2 = relation_consistency_loss(a2, b2, max_tile=128)
    jax.block_until_ready((loss2, sim2))
    ref_l2, ref_s2 = _reference(a2, b2)
    assert sim2.shape == (N2, N2)
    assert jnp.allclose(sim2, ref_s2, atol=1e-5), "similarity mismatch (case 2)"
    assert jnp.allclose(loss2, ref_l2, atol=1e-5), "loss mismatch (case 2)"

    # Case 3: same problem forced down the streamed (panel double-buffering)
    # fallback path to validate both code paths.
    loss3, sim3 = relation_consistency_loss(a2, b2, max_tile=128,
                                            force_streamed=True)
    jax.block_until_ready((loss3, sim3))
    assert jnp.allclose(sim3, ref_s2, atol=1e-5), "similarity mismatch (case 3)"
    assert jnp.allclose(loss3, ref_l2, atol=1e-5), "loss mismatch (case 3)"

    print("KERNEL_OK")
</pallas_src>

<mosaic_0001>
module attributes {stable_mosaic.version = 11 : i64} {
  func.func @_normalize_kernel(%arg0: i32, %arg1: memref<8x32xf32, #tpu.memory_space<vmem>>, %arg2: memref<8x32xf32, #tpu.memory_space<vmem>>) attributes {dimension_semantics = [#tpu.dimension_semantics<parallel>], iteration_bounds = array<i64: 1>, scalar_prefetch = 0 : i64, scratch_operands = 0 : i64, tpu.core_type = #tpu.core_type<tc>, window_params = [{transform_indices = @transform_0, window_bounds = array<i64: 8, 32>}, {transform_indices = @transform_1, window_bounds = array<i64: 8, 32>}]} {
    %c0 = arith.constant 0 : index
    %c0_0 = arith.constant 0 : index
    %0 = vector.load %arg1[%c0, %c0_0] : memref<8x32xf32, #tpu.memory_space<vmem>>, vector<8x32xf32>
    %1 = arith.mulf %0, %0 : vector<8x32xf32>
    %cst = arith.constant dense<0.000000e+00> : vector<8xf32>
    %2 = vector.multi_reduction <add>, %1, %cst [1] : vector<8x32xf32> to vector<8xf32>
    %3 = vector.shape_cast %2 : vector<8xf32> to vector<8x1xf32>
    %cst_1 = arith.constant 1.000000e-24 : f32
    %4 = vector.broadcast %cst_1 : f32 to vector<8x1xf32>
    %5 = arith.maximumf %3, %4 : vector<8x1xf32>
    %6 = math.rsqrt %5 : vector<8x1xf32>
    %7 = vector.broadcast %6 : vector<8x1xf32> to vector<8x32xf32>
    %8 = arith.mulf %0, %7 : vector<8x32xf32>
    %c0_2 = arith.constant 0 : index
    %c0_3 = arith.constant 0 : index
    %9 = vector.load %arg2[%c0_2, %c0_3] : memref<8x32xf32, #tpu.memory_space<vmem>>, vector<8x32xf32>
    tpu.vector_store %arg2[%c0_2, %c0_3], %8 {strides = array<i32>} : memref<8x32xf32, #tpu.memory_space<vmem>>, vector<8x32xf32>,
    return
  }
  func.func @transform_0(%arg0: i32) -> (i32, i32) {
    %c0_i32 = arith.constant 0 : i32
    %c0_i32_0 = arith.constant 0 : i32
    return %arg0, %c0_i32 : i32, i32
  }
  func.func @transform_1(%arg0: i32) -> (i32, i32) {
    %c0_i32 = arith.constant 0 : i32
    %c0_i32_0 = arith.constant 0 : i32
    return %arg0, %c0_i32 : i32, i32
  }
}

</mosaic_0001>

<bundles_post_ra>
// kernel: tpu_custom_call.1
= control target key start
LH: loop header
LB: loop body
LE: loop exit
PB: predicated region body
PF: predicated region fallthrough
CT: control target
= control target key end

     0   :  { %6 = vsyncpa [#allocation3], 0  ;;  %s134_s0 = inlined_call_operand.hbm [shape: f32[8,32], index: 0, kind: input, shape index: {}]   ;;  %s135_s1 = inlined_call_operand.hbm [shape: f32[8,32], index: 1, kind: output, shape index: {}]  }
   0x1   :  { %7 = vsyncpa [#allocation4], 0  ;;  %s98_s6 = smov [#allocation2]   ;;  %s50_s10 = scalar_lea.hbm %s134_s0, 128 }
   0x2   :  { %s14_s7 = sshll.u32 %s98_s6, 4  ;;  %p51_p0 = scmp.ne.s32.totalorder %s134_s0, %s50_s10  ;;  %s15_s7 = int_to_ptr.vmem [resolvable:$true] %s14_s7 }
   0x3   :  { %p54_p1 = scmp.lt.u32.totalorder %s50_s10, %s134_s0 }
   0x5   :  { %p56_p2 = pnand %p54_p1, %p51_p0 }
   0x7   :  { %59 = shalt.err (!%p56_p2)
}
   0x8   :  { %s60_s15 = scalar_lea.vmem %s15_s7, 128  ;;  %p65_p4 = scmp.lt.s32.totalorder %s15_s7, %s15_s7 }
   0x9   :  { %p61_p3 = scmp.ne.s32.totalorder %s15_s7, %s60_s15  ;;  %p66_p5 = scmp.lt.s32.totalorder %s60_s15, %s60_s15 }
   0xb   :  { %p67_p6 = por %p66_p5, %p65_p4 }
   0xd   :  { %p68_p7 = pnand %p67_p6, %p61_p3 }
   0xf   :  { %71 = shalt.err (!%p68_p7)
}
  0x10   :  { %17 = dma.hbm_to_vmem [thread:$0]  %s134_s0, 128, %s15_s7, [#allocation3]  }
  0x11   :  { %94 = dma.done.wait [#allocation3], 128  }
  0x12   :  { %95 = vsyncadd [#allocation3], 4294967168  ;;  %v21_v0 = vld [vmem:[#allocation2] sm:$0xff]  ;;  %vm23_vm0 = vcmask 261120   ;;  %s99_s18 = smov [#allocation5]  }
  0x13   :  { %v22_v1 = vmul.f32 %v21_v0, %v21_v0  ;;  %s37_s19 = sshll.u32 %s99_s18, 4  ;;  %s38_s19 = int_to_ptr.vmem [resolvable:$true] %s37_s19 }
  0x14   :  { %s72_s20 = scalar_lea.vmem %s38_s19, 128  ;;  %p77_p9 = scmp.lt.s32.totalorder %s38_s19, %s38_s19 }
  0x15   :  { %v24_v2 = vsel %vm23_vm0, %v22_v1, 0.0  ;;  %p73_p8 = scmp.ne.s32.totalorder %s38_s19, %s72_s20  ;;  %p78_p10 = scmp.lt.s32.totalorder %s72_s20, %s72_s20 }
  0x16   :  { %25 = vadd.xlane.f32.xlu0 %v24_v2 }
  0x17   :  { %p79_p11 = por %p78_p10, %p77_p9 }
  0x19   :  { %p80_p12 = pnand %p79_p11, %p73_p8 }
  0xa3   :  { %v26_v3 = vpop.xlane.xlu0 %25 }
  0xa4   :  { %v27_v4 = vmax.f32 %v26_v3, 1e-24 }
  0xa6   :  { %48 = vrsqrt.f32 %v27_v4 }
  0xb0   :  { %v49_v5 = vpop.eup %48 }
  0xb1   :  { %v29_v6 = vmul.f32 %v49_v5, %v21_v0 }
  0xb3   :  { %30 = vst.msk [vmem:[#allocation5] sm:$0xff] %vm23_vm0, %v29_v6 }
  0xb4   :  { %83 = shalt.err (!%p80_p12)
}
  0xb5   :  { %s84_s22 = scalar_lea.hbm %s135_s1, 128 }
  0xb6   :  { %p85_p13 = scmp.ne.s32.totalorder %s135_s1, %s84_s22  ;;  %p88_p0 = scmp.lt.u32.totalorder %s84_s22, %s135_s1 }
  0xb8   :  { %p90_p1 = pnand %p88_p0, %p85_p13 }
  0xba   :  { %93 = shalt.err (!%p90_p1)
}
  0xbb   :  { %40 = dma.vmem_to_hbm [thread:$0]  %s38_s19, 128, %s135_s1, [#allocation4]  }
  0xbc   :  { %96 = dma.done.wait [#allocation4], 128  }
  0xbd   :  { %97 = vsyncadd [#allocation4], 4294967168 }
  0xbe   :  { %44 = vsyncpa [#allocation3], 1 }
  0xbf   :  { %45 = vsyncpa [#allocation4], 1 }

</bundles_post_ra>
